<compile_context>
chip_gen: v5e
topology: v5e:2x2
jax: 0.10.0
libtpu: 0.0.40
codegen_flags: <defaults>
</compile_context>

<pallas_src>
import functools

import jax
import jax.numpy as jnp
from jax.experimental import pallas as pl
from jax.experimental.pallas import tpu as pltpu

# Small, shape-consistent config (hidden divisible by heads).
BATCH = 2
SEQ = 8
HIDDEN = 32
NUM_HEADS = 4
HEAD_SIZE = HIDDEN // NUM_HEADS


def mha_kernel(x_ref, wqkv_ref, wo_ref, o_ref, *, seq, num_heads, head_size):
    """Fused MHA for one batch element.

    x_ref    : (1, S, H)   hidden states (bf16)
    wqkv_ref : (H, 3H)     fused qkv.weight.T, Q columns pre-scaled by 1/sqrt(hd)
    wo_ref   : (H, H)      out_proj.weight.T
    o_ref    : (1, S, H)   output (f32)
    """
    hidden = num_heads * head_size
    x = x_ref[0]                                           # (S, H), bf16
    op_dtype = x.dtype

    # Fused QKV projection: ONE wide, lane-dense MXU matmul, f32 accumulation.
    qkv = jnp.dot(x, wqkv_ref[...],
                  preferred_element_type=jnp.float32)      # (S, 3H)
    q = qkv[:, :hidden]                                    # scale already folded in
    k = qkv[:, hidden:2 * hidden]
    v = qkv[:, 2 * hidden:]

    # Head-major (nH, S, hd) operands for the batched attention core.
    def to_heads(t):
        return t.reshape(seq, num_heads, head_size).transpose(1, 0, 2)

    q3 = to_heads(q).astype(op_dtype)
    k3 = to_heads(k).astype(op_dtype)
    v3 = to_heads(v).astype(op_dtype)

    # Scores: contract the last dims directly (no materialized k.T).
    s = jnp.einsum("hqd,hkd->hqk", q3, k3,
                   preferred_element_type=jnp.float32)     # (nH, S, S)

    # Numerically stable softmax in f32; reciprocal on the (otherwise idle)
    # EUP slot instead of a VALU divide.
    m = jnp.max(s, axis=-1, keepdims=True)
    e = jnp.exp(s - m)
    denom = jnp.sum(e, axis=-1, keepdims=True)
    p = (e * pl.reciprocal(denom, approx=True)).astype(op_dtype)

    ctx = jnp.einsum("hqk,hkd->hqd", p, v3,
                     preferred_element_type=jnp.float32)   # (nH, S, hd)

    # Merge heads back to a lane-contiguous (S, H) slab, then ONE output
    # projection with K = H (instead of num_heads K=hd matmuls).
    ctx2 = ctx.transpose(1, 0, 2).reshape(seq, hidden).astype(op_dtype)
    out = jnp.dot(ctx2, wo_ref[...],
                  preferred_element_type=jnp.float32)      # (S, H)

    o_ref[0] = out.astype(o_ref.dtype)


def multi_head_attention(x, w_qkv, w_out, *, num_heads=NUM_HEADS):
    """x: (B, S, H); w_qkv: (H, 3H) == qkv.weight.T; w_out: (H, H) == out_proj.weight.T."""
    B, S, H = x.shape
    hd = H // num_heads
    scale = hd ** (-0.5)

    # One-time parameter transform: fold 1/sqrt(hd) into the Q columns.
    w_qkv_scaled = w_qkv.at[:, :H].multiply(scale)

    # bf16 MXU operands (accumulation stays f32 inside the kernel).
    xb = x.astype(jnp.bfloat16)
    wqkv_b = w_qkv_scaled.astype(jnp.bfloat16)
    wo_b = w_out.astype(jnp.bfloat16)

    kernel = functools.partial(mha_kernel, seq=S, num_heads=num_heads,
                               head_size=hd)

    out = pl.pallas_call(
        kernel,
        out_shape=jax.ShapeDtypeStruct((B, S, H), x.dtype),
        grid=(B,),
        in_specs=[
            pl.BlockSpec((1, S, H), lambda b: (b, 0, 0)),      # per-batch row tile
            pl.BlockSpec((H, 3 * H), lambda b: (0, 0)),        # resident weights
            pl.BlockSpec((H, H), lambda b: (0, 0)),
        ],
        out_specs=pl.BlockSpec((1, S, H), lambda b: (b, 0, 0)),
        compiler_params=pltpu.CompilerParams(
            dimension_semantics=("parallel",)),                # v7x: shard over 2 TCs
    )(xb, wqkv_b, wo_b)

    return out


def reference_mha(x, w_qkv, w_out):
    """Pure-JAX f32 reference mirroring the PyTorch forward (eval mode, no mask)."""
    B, S, H = x.shape
    qkv = x @ w_qkv                                               # (B, S, 3H)
    q, k, v = jnp.split(qkv, 3, axis=-1)

    def heads(t):
        return t.reshape(B, S, NUM_HEADS, HEAD_SIZE).transpose(0, 2, 1, 3)

    q, k, v = heads(q), heads(k), heads(v)                        # (B, nH, S, hd)
    scores = jnp.einsum("bhqd,bhkd->bhqk", q, k) * (HEAD_SIZE ** -0.5)
    probs = jax.nn.softmax(scores, axis=-1)
    ctx = jnp.einsum("bhqk,bhkd->bhqd", probs, v)
    ctx = ctx.transpose(0, 2, 1, 3).reshape(B, S, H)
    return ctx @ w_out


if __name__ == "__main__":
    key = jax.random.PRNGKey(0)
    kx, kq, ko = jax.random.split(key, 3)

    x = jax.random.normal(kx, (BATCH, SEQ, HIDDEN), dtype=jnp.float32)

    # PyTorch Linear weights are [out, in]; store transposed for x @ W usage.
    initializer_range = 0.02
    w_qkv_torch = jax.random.normal(kq, (3 * HIDDEN, HIDDEN), dtype=jnp.float32) * initializer_range
    w_out_torch = jax.random.normal(ko, (HIDDEN, HIDDEN), dtype=jnp.float32) * initializer_range
    w_qkv = w_qkv_torch.T     # (H, 3H)
    w_out = w_out_torch.T     # (H, H)

    out = multi_head_attention(x, w_qkv, w_out)
    out = jax.block_until_ready(out)

    ref = reference_mha(x, w_qkv, w_out)
    assert out.shape == (BATCH, SEQ, HIDDEN)
    # Tolerance accounts for bf16 MXU operands and the EUP approx-reciprocal
    # in the softmax denominator (reference is pure f32).
    assert jnp.allclose(out, ref, atol=2e-3, rtol=2e-2), "mismatch vs reference"

    print("KERNEL_OK")
</pallas_src>

<mosaic_0001>
module attributes {stable_mosaic.version = 11 : i64} {
  func.func @mha_kernel(%arg0: i32, %arg1: memref<1x8x32xbf16, #tpu.memory_space<vmem>>, %arg2: memref<32x96xbf16, #tpu.memory_space<vmem>>, %arg3: memref<32x32xbf16, #tpu.memory_space<vmem>>, %arg4: memref<1x8x32xf32, #tpu.memory_space<vmem>>) attributes {dimension_semantics = [#tpu.dimension_semantics<parallel>], iteration_bounds = array<i64: 2>, scalar_prefetch = 0 : i64, scratch_operands = 0 : i64, tpu.core_type = #tpu.core_type<tc>, window_params = [{transform_indices = @transform_0, window_bounds = array<i64: 1, 8, 32>}, {pipeline_mode = #tpu.pipeline_mode<synchronous>, transform_indices = @transform_1, window_bounds = array<i64: 32, 96>}, {pipeline_mode = #tpu.pipeline_mode<synchronous>, transform_indices = @transform_2, window_bounds = array<i64: 32, 32>}, {transform_indices = @transform_3, window_bounds = array<i64: 1, 8, 32>}]} {
    %c0 = arith.constant 0 : index
    %c0_0 = arith.constant 0 : index
    %c0_1 = arith.constant 0 : index
    %0 = vector.load %arg1[%c0, %c0_0, %c0_1] : memref<1x8x32xbf16, #tpu.memory_space<vmem>>, vector<1x8x32xbf16>
    %1 = vector.shape_cast %0 : vector<1x8x32xbf16> to vector<8x32xbf16>
    %c0_2 = arith.constant 0 : index
    %c0_3 = arith.constant 0 : index
    %2 = vector.load %arg2[%c0_2, %c0_3] : memref<32x96xbf16, #tpu.memory_space<vmem>>, vector<32x96xbf16>
    %cst = arith.constant dense<0.000000e+00> : vector<8x96xf32>
    %3 = tpu.matmul %1, %2, %cst {dimension_numbers = #tpu.dot_dimension_numbers<[1], [0], [0], [1], [0, 0, 1, 1], [], []>} : vector<8x32xbf16>, vector<32x96xbf16>, vector<8x96xf32> -> vector<8x96xf32>
    %4 = vector.extract_strided_slice %3 {offsets = [0, 0], sizes = [8, 32], strides = [1, 1]} : vector<8x96xf32> to vector<8x32xf32>
    %5 = vector.extract_strided_slice %3 {offsets = [0, 32], sizes = [8, 32], strides = [1, 1]} : vector<8x96xf32> to vector<8x32xf32>
    %6 = vector.extract_strided_slice %3 {offsets = [0, 64], sizes = [8, 32], strides = [1, 1]} : vector<8x96xf32> to vector<8x32xf32>
    %7 = vector.shape_cast %4 : vector<8x32xf32> to vector<8x4x8xf32>
    %8 = tpu.transpose %7, [1, 0, 2] : vector<8x4x8xf32> -> vector<4x8x8xf32>
    %9 = arith.truncf %8 : vector<4x8x8xf32> to vector<4x8x8xbf16>
    %10 = vector.shape_cast %5 : vector<8x32xf32> to vector<8x4x8xf32>
    %11 = tpu.transpose %10, [1, 0, 2] : vector<8x4x8xf32> -> vector<4x8x8xf32>
    %12 = arith.truncf %11 : vector<4x8x8xf32> to vector<4x8x8xbf16>
    %13 = vector.shape_cast %6 : vector<8x32xf32> to vector<8x4x8xf32>
    %14 = tpu.transpose %13, [1, 0, 2] : vector<8x4x8xf32> -> vector<4x8x8xf32>
    %15 = arith.truncf %14 : vector<4x8x8xf32> to vector<4x8x8xbf16>
    "tpu.trace_start"() <{level = 10 : i32, message = "hqd,hkd->hqk"}> : () -> ()
    %cst_4 = arith.constant dense<0.000000e+00> : vector<4x8x8xf32>
    %16 = tpu.matmul %9, %12, %cst_4 {dimension_numbers = #tpu.dot_dimension_numbers<[2], [2], [1], [1], [0, 0, 0, 1, 1, 1], [0], [0]>} : vector<4x8x8xbf16>, vector<4x8x8xbf16>, vector<4x8x8xf32> -> vector<4x8x8xf32>
    "tpu.trace_stop"() : () -> ()
    %cst_5 = arith.constant dense<0xFF800000> : vector<4x8xf32>
    %17 = vector.multi_reduction <maximumf>, %16, %cst_5 [2] : vector<4x8x8xf32> to vector<4x8xf32>
    %18 = vector.shape_cast %17 : vector<4x8xf32> to vector<4x8x1xf32>
    %19 = vector.broadcast %18 : vector<4x8x1xf32> to vector<4x8x8xf32>
    %20 = arith.subf %16, %19 : vector<4x8x8xf32>
    %21 = math.exp %20 : vector<4x8x8xf32>
    %cst_6 = arith.constant dense<0.000000e+00> : vector<4x8xf32>
    %22 = vector.multi_reduction <add>, %21, %cst_6 [2] : vector<4x8x8xf32> to vector<4x8xf32>
    %23 = vector.shape_cast %22 : vector<4x8xf32> to vector<4x8x1xf32>
    %24 = tpu.reciprocal %23 {approx = true} : vector<4x8x1xf32> -> vector<4x8x1xf32>
    %25 = vector.broadcast %24 : vector<4x8x1xf32> to vector<4x8x8xf32>
    %26 = arith.mulf %21, %25 : vector<4x8x8xf32>
    %27 = arith.truncf %26 : vector<4x8x8xf32> to vector<4x8x8xbf16>
    "tpu.trace_start"() <{level = 10 : i32, message = "hqk,hkd->hqd"}> : () -> ()
    %cst_7 = arith.constant dense<0.000000e+00> : vector<4x8x8xf32>
    %28 = tpu.matmul %27, %15, %cst_7 {dimension_numbers = #tpu.dot_dimension_numbers<[2], [1], [1], [2], [0, 0, 0, 1, 1, 2], [0], [0]>} : vector<4x8x8xbf16>, vector<4x8x8xbf16>, vector<4x8x8xf32> -> vector<4x8x8xf32>
    "tpu.trace_stop"() : () -> ()
    %29 = tpu.transpose %28, [1, 0, 2] : vector<4x8x8xf32> -> vector<8x4x8xf32>
    %30 = vector.shape_cast %29 : vector<8x4x8xf32> to vector<8x32xf32>
    %31 = arith.truncf %30 : vector<8x32xf32> to vector<8x32xbf16>
    %c0_8 = arith.constant 0 : index
    %c0_9 = arith.constant 0 : index
    %32 = vector.load %arg3[%c0_8, %c0_9] : memref<32x32xbf16, #tpu.memory_space<vmem>>, vector<32x32xbf16>
    %cst_10 = arith.constant dense<0.000000e+00> : vector<8x32xf32>
    %33 = tpu.matmul %31, %32, %cst_10 {dimension_numbers = #tpu.dot_dimension_numbers<[1], [0], [0], [1], [0, 0, 1, 1], [], []>} : vector<8x32xbf16>, vector<32x32xbf16>, vector<8x32xf32> -> vector<8x32xf32>
    %c0_11 = arith.constant 0 : index
    %c0_12 = arith.constant 0 : index
    %c0_13 = arith.constant 0 : index
    %34 = vector.load %arg4[%c0_11, %c0_12, %c0_13] : memref<1x8x32xf32, #tpu.memory_space<vmem>>, vector<1x8x32xf32>
    %35 = vector.shape_cast %34 : vector<1x8x32xf32> to vector<8x32xf32>
    %36 = vector.shape_cast %33 : vector<8x32xf32> to vector<1x8x32xf32>
    tpu.vector_store %arg4[%c0_11, %c0_12, %c0_13], %36 {strides = array<i32>} : memref<1x8x32xf32, #tpu.memory_space<vmem>>, vector<1x8x32xf32>,
    return
  }
  func.func @transform_0(%arg0: i32) -> (i32, i32, i32) {
    %c0_i32 = arith.constant 0 : i32
    %c0_i32_0 = arith.constant 0 : i32
    %c0_i32_1 = arith.constant 0 : i32
    return %arg0, %c0_i32, %c0_i32_0 : i32, i32, i32
  }
  func.func @transform_1(%arg0: i32) -> (i32, i32) {
    %c0_i32 = arith.constant 0 : i32
    %c0_i32_0 = arith.constant 0 : i32
    %c0_i32_1 = arith.constant 0 : i32
    return %c0_i32, %c0_i32_0 : i32, i32
  }
  func.func @transform_2(%arg0: i32) -> (i32, i32) {
    %c0_i32 = arith.constant 0 : i32
    %c0_i32_0 = arith.constant 0 : i32
    %c0_i32_1 = arith.constant 0 : i32
    return %c0_i32, %c0_i32_0 : i32, i32
  }
  func.func @transform_3(%arg0: i32) -> (i32, i32, i32) {
    %c0_i32 = arith.constant 0 : i32
    %c0_i32_0 = arith.constant 0 : i32
    %c0_i32_1 = arith.constant 0 : i32
    return %arg0, %c0_i32, %c0_i32_0 : i32, i32, i32
  }
}

</mosaic_0001>

<bundles_post_ra>
// kernel: tpu_custom_call.1
= control target key start
LH: loop header
LB: loop body
LE: loop exit
PB: predicated region body
PF: predicated region fallthrough
CT: control target
= control target key end

     0   :  { %8 = vsyncpa [#allocation3], 0  ;;  %s1820_s0 = inlined_call_operand.hbm [shape: bf16[2,8,32], index: 0, kind: input, shape index: {}]   ;;  %s1821_s1 = inlined_call_operand.hbm [shape: bf16[32,96], index: 1, kind: input, shape index: {}]   ;;  %s1822_s2 = inlined_call_operand.hbm [shape: bf16[32,32], index: 2, kind: input, shape index: {}]   ;;  %s1823_s3 = inlined_call_operand.hbm [shape: f32[2,8,32], index: 3, kind: output, shape index: {}]  }
   0x1   :  { %10 = vsyncpa [#allocation3 + $0x1], 0 }
   0x2   :  { %11 = vsyncpa [#allocation6], 0 }
   0x3   :  { %12 = vsyncpa [#allocation4], 0 }
   0x4   :  { %14 = vsyncpa [#allocation4 + $0x1], 0  ;;  %s1458_s12 = smov 0   ;;  %s1460_s13 = smov 0  }
   0x5   :  { %s1462_s14 = smov 0   ;;  %s1464_s15 = smov 0  }
   0x6 LB: > { %s130_s18 = sshll.u32 %s1821_s1, 4  ;;  %s1482_s19 = sadd.s32 4294967295, %s1422_s15   ;;  %s1422_s15 = sphi %s1464_s15, %s1834_s15   ;;  %s1418_s14 = sphi %s1462_s14, %s1833_s14   ;;  %s1414_s13 = sphi %s1460_s13, %s1832_s13   ;;  %s1410_s12 = sphi %s1458_s12, %s1831_s12   ;;  %s131_s18 = int_to_ptr.hbm [resolvable:$true] %s130_s18 }
   0x7   : > { %p1102_p0 = scmp.ge.s32.totalorder %s1422_s15, 1  ;;  %p41_p1 = scmp.eq.s32.totalorder %s1482_s19, 0 }
   0x8   : > { %p119_p2 = scmp.lt.s32.totalorder %s1422_s15, 3  ;;  %s1424_s21 = smov [#allocation5]  }
   0x9   : > { %s132_s22 = sshll.u32 %s1424_s21, 4  ;;  %s144_s25 = sshll.u32 %s1822_s2, 4  ;;  %s133_s22 = int_to_ptr.vmem [resolvable:$true] %s132_s22  ;;  %s145_s25 = int_to_ptr.hbm [resolvable:$true] %s144_s25 }
   0xa   : > { %p1487_p3 = pnand %p1102_p0, %p119_p2  ;;  %s1425_s26 = smov [#allocation7]  }
   0xb   : > { %s146_s27 = sshll.u32 %s1425_s26, 4  ;;  %s1426_s28 = smov 64   ;;  %s147_s27 = int_to_ptr.vmem [resolvable:$true] %s146_s27 }
   0xc   : > { %p1159_p4 = pneg %p1487_p3  ;;  %s1427_s29 = smov 4  }
   0xd   : > { %s1101_s30 = sadd.s32 4294967294, %s1422_s15   ;;  %s1501_s4 = sadd.s32 1, %s1422_s15  }
   0xe   : > { %p1160_p6 = pnand %p1159_p4, %p41_p1  ;;  %s24_s5 = ssub.s32 %s1422_s15, %s1501_s4 }
   0xf   : > { %s27_s6 = sadd.s32 1, %s1418_s14  ;;  %p25_p7 = scmp.eq.s32.totalorder %s24_s5, 0 }
  0x10   : > { %1162 = dma.hbm_to_vmem [thread:$0]  (!%p1160_p6), %s131_s18, 256, %s133_s22, [#allocation6], %s1426_s28, %s1426_s28, %s1427_s29  }
  0x11   : > { %1165 = dma.hbm_to_vmem [thread:$0]  (!%p1160_p6), %s145_s25, 256, %s147_s27, [#allocation6], %s1426_s28, %s1426_s28, %s1427_s29  }
  0x12   : > { %p34_p8 = scmp.ne.s32.totalorder %s1418_s14, %s1414_s13  ;;  %p35_p9 = scmp.eq.s32.totalorder %s1422_s15, 0 }
  0x13   : > { %p40_p10 = scmp.ne.s32.totalorder %s1414_s13, %s1410_s12  ;;  %p106_p13 = scmp.eq.s32.totalorder %s1482_s19, 1 }
  0x14   : > { %s1512_s7 = scalar_select %p25_p7, %s1418_s14, %s27_s6  }
  0x15   : > { %p1514_p11 = por %p35_p9, %p34_p8  ;;  %p1520_p12 = por %p41_p1, %p40_p10 }
  0x16   : > { %p112_p0 = scmp.eq.s32.totalorder %s1101_s30, 1  ;;  %p1176_p2 = scmp.lt.s32.totalorder %s1422_s15, 2 }
  0x17   : > { %s160_s10 = sand.u32 1, %s1418_s14   ;;  %p1527_p4 = por %p106_p13, %p34_p8 }
  0x18   : > { %p1531_p6 = por %p112_p0, %p40_p10  ;;  %s1106_s17 = sshll.u32 %s160_s10, 2 }
  0x19   : > { %s1107_s18 = sshll.u32 %s1422_s15, 2  ;;  %s164_s24 = scalar_lea.vmem [#allocation2], %s1106_s17 }
  0x1a   : > { %s168_s23 = scalar_lea.hbm %s1820_s0, %s1107_s18  ;;  %s172_s25 = sshll.u32 %s164_s24, 4  ;;  %s173_s25 = int_to_ptr.vmem [resolvable:$true] %s172_s25 }
  0x1b   : > { %s170_s26 = sshll.u32 %s168_s23, 4  ;;  %p1541_p7 = pnand %p1176_p2, %p1514_p11  ;;  %s171_s26 = int_to_ptr.hbm [resolvable:$true] %s170_s26 }
  0x1c   : > { %s161_s28 = scalar_lea.sflag [#allocation3], %s160_s10  ;;  %s1322_s29 = sshra.s32 %s171_s26, 4  ;;  %s1323_s29 = int_to_ptr.hbm [resolvable:$true] %s1322_s29 }
  0x1d   : > { %s1324_s30 = scalar_lea.hbm %s1323_s29, 4  ;;  %p1326_p9 = pneg %p1541_p7 }
  0x1e   : > { %p1325_p8 = scmp.ne.s32.totalorder %s1323_s29, %s1324_s30  ;;  %s1329_s17 = scalar_lea.hbm %s1820_s0, 8 }
  0x1f   : > { %p1330_p11 = scmp.lt.s32.totalorder %s1323_s29, %s1820_s0  ;;  %p1331_p0 = scmp.lt.s32.totalorder %s1329_s17, %s1324_s30 }
  0x20   : > { %p1327_p10 = pnand %p1326_p9, %p1325_p8 }
  0x21   : > { %p1332_p2 = por %p1331_p0, %p1330_p11 }
  0x22   : > { %p1328_p13 = pneg %p1327_p10 }
  0x24   : > { %p1333_p5 = pnand %p1332_p2, %p1328_p13 }
  0x26   : > { %1336 = shalt.err (!%p1333_p5)
}
  0x27   : > { %1169 = dma.hbm_to_vmem [thread:$0]  (!%p1541_p7), %s171_s26, 64, %s173_s25, %s161_s28  }
  0x28   : > { %181 = sbr.rel (%p1487_p3) target bundleno = 1257 (0x4e9), region = 32  ;;  %s1558_s10 = sand.u32 (!%p1487_p3), 1, %s1414_s13  }
  0x29   : > { %s1109_s21 = sshll.u32 (!%p1487_p3), %s1558_s10, 2  ;;  %s184_s22 = scalar_lea.sflag (!%p1487_p3), [#allocation3], %s1558_s10 }
  0x2a   : > { %s187_s23 = scalar_lea.vmem (!%p1487_p3), [#allocation2], %s1109_s21 }
  0x2d   : > { %1397 = dma.done.wait (%p1520_p12), %s184_s22, 64  }
  0x2e   : > { %1399 = vsyncadd (%p1520_p12), %s184_s22, 4294967232 }
  0x2f   : > { %1401 = dma.done.wait (%p41_p1), [#allocation6], 512  }
  0x30   : > { %1403 = vsyncadd (%p41_p1), [#allocation6], 4294966784  ;;  %v1144_v0 = vld [vmem:[#allocation5 + $0x8] sm:$0xff]  ;;  %v1143_v1 = vld [vmem:[#allocation5] sm:$0xff]  ;;  %vm239_vm0 = vcmask 261120   ;;  %s1428_s20 = smov 104  }
  0x31   : > { %249 = vmatpush.bf16.msra.mxu0 %v1144_v0  ;;  %v222_v2 = vld [vmem:[%s187_s23] sm:$0xf]  ;;  %s1429_s24 = smov 120   ;;  %s1430_s9 = smov 112   ;;  %v1432_v11 = vmov 1983009808  }
  0x32   : > { %s1431_s25 = smov 96   ;;  %v272_v12 = vunpack.c.l.s4 %v1432_v11  ;;  %vm267_vm1 = vcmask 1047556   ;;  %v1433_v25 = vmov 1934713408   ;;  %vm633_vm2 = vcmask 64512   ;;  %s1434_s26 = smov 64  }
  0x33   : > { %v296_v26 = vunpack.c.l.s4 %v1433_v25  ;;  %vm761_vm3 = vcmask 1043456   ;;  %s1435_s27 = smov 16   ;;  %s1436_s28 = smov 8   ;;  %vm958_vm4 = vcmask 130048   ;;  %vm960_vm5 = vcmask 195584  }
  0x34   : > { %v1579_v16 = vunpack.c.0.s8 %v272_v12  ;;  %s1437_s29 = smov 24   ;;  %s1140_s30 = sshll.u32 %s1482_s19, 3 }
  0x35   : > { %250 = vmatpush.bf16.msra.mxu0 %v1143_v1  ;;  %v1589_v31 = vunpack.c.0.s8 %v296_v26  ;;  %s1112_s5 = sshll.u32 %s1558_s10, 3  ;;  %s1007_s18 = scalar_lea.hbm %s1823_s3, %s1140_s30 }
  0x36   : > { %s220_s8 = scalar_lea.vmem [#allocation8], %s1112_s5  ;;  %s1011_s22 = sshll.u32 %s1007_s18, 4  ;;  %s1012_s22 = int_to_ptr.hbm [resolvable:$true] %s1011_s22 }
  0x37   : > { %s1009_s21 = sshll.u32 %s220_s8, 4  ;;  %s997_s23 = scalar_lea.sflag [#allocation4], %s1558_s10  ;;  %s1010_s21 = int_to_ptr.vmem [resolvable:$true] %s1009_s21 }
  0x38   : > { %1121 = vmatmul.msk.bf16.vlgmr.msra.gmra.mxu0 %vm239_vm0, %v222_v2 }
  0xb5   : > { %v252_v3 = vpop.f32.mrf.mxu0 }
  0xb6   : > { %263 = vrot.lane.b32.xlu1 %v252_v3, %s1428_s20  ;;  %257 = vrot.lane.b32.xlu0 %v252_v3, %s1429_s24  ;;  %v269_v13 = vrot.slane %v252_v3, 4  ;;  %s1366_s20 = sshra.s32 %s1012_s22, 4  ;;  %s1367_s20 = int_to_ptr.hbm [resolvable:$true] %s1366_s20 }
  0xb7   : > { %s1368_s24 = scalar_lea.hbm %s1367_s20, 8  ;;  %p1373_p12 = scmp.lt.s32.totalorder %s1367_s20, %s1823_s3 }
  0xb8   : > { %p1369_p1 = scmp.ne.s32.totalorder %s1367_s20, %s1368_s24 }
  0xba   : > { %p1370_p3 = pnand %p1369_p1, %p1527_p4 }
  0xbc   : > { %p1371_p5 = pneg %p1370_p3 }
  0xbd   : > { %v254_v4 = vpop.f32.mrf.mxu0 }
  0xbe   : > { %260 = vrot.lane.b32.xlu0 %v252_v3, %s1430_s9 }
 0x128   : > { %v258_v5 = vpop.permute.xlu0 %257  ;;  %v264_v7 = vpop.permute.xlu1 %263 }
 0x129   : > { %v1571_v6 = vpack.i.bf16 %v258_v5, %v252_v3  ;;  %v279_v17 = vrot.slane %v264_v7, 4  ;;  %v281_v18 = vrot.slane %v258_v5, 4 }
 0x12b   : > { %1227 = vrot.lane.b32.xlu1 %v1571_v6, %s1431_s25  ;;  %v280_v21 = vsel %vm267_vm1, %v279_v17, %v258_v5  ;;  %v282_v22 = vsel %vm267_vm1, %v264_v7, %v281_v18 }
 0x12c   : > { %v286_v27 = vperm.slane %v280_v21, %v1579_v16  ;;  %v290_v28 = vperm.slane %v282_v22, %v1579_v16 }
 0x12e   : > { %v291_v32 = vrot.slane %v286_v27, 4  ;;  %v303_v33 = vrot.slane %v290_v28, 4 }
 0x130   : > { %v261_v8 = vpop.permute.xlu0 %260 }
 0x131   : > { %v1574_v9 = vpack.i.bf16 %v264_v7, %v261_v8  ;;  %v266_v10 = vrot.slane %v261_v8, 4  ;;  %v270_v15 = vsel %vm267_vm1, %v261_v8, %v269_v13 }
 0x132   : > { %v278_v20 = vperm.slane %v270_v15, %v1579_v16 }
 0x133   : > { %1232 = vrot.lane.b32.xlu2 %v1574_v9, %s1431_s25  ;;  %v268_v14 = vsel %vm267_vm1, %v266_v10, %v252_v3  ;;  %s1372_s25 = scalar_lea.hbm %s1823_s3, 16 }
 0x134   : > { %v274_v19 = vperm.slane %v268_v14, %v1579_v16  ;;  %v305_v24 = vrot.slane %v278_v20, 4  ;;  %v304_v38 = vsel %vm267_vm1, %v303_v33, %v278_v20  ;;  %p1374_p7 = scmp.lt.s32.totalorder %s1372_s25, %s1368_s24 }
 0x135   : > { %v310_v42 = vperm.slane %v304_v38, %v1589_v31 }
 0x136   : > { %v293_v23 = vrot.slane %v274_v19, 4  ;;  %v306_v30 = vsel %vm267_vm1, %v290_v28, %v305_v24  ;;  %v292_v37 = vsel %vm267_vm1, %v291_v32, %v274_v19  ;;  %p1375_p8 = por %p1374_p7, %p1373_p12 }
 0x137   : > { %v314_v35 = vperm.slane %v306_v30, %v1589_v31  ;;  %v298_v41 = vperm.slane %v292_v37, %v1589_v31  ;;  %v319_v52 = vrot.slane %v310_v42, 4 }
 0x138   : > { %v294_v29 = vsel %vm267_vm1, %v286_v27, %v293_v23  ;;  %p1376_p9 = pnand %p1375_p8, %p1371_p5 }
 0x139   : > { %v302_v34 = vperm.slane %v294_v29, %v1589_v31  ;;  %v321_v44 = vrot.slane %v314_v35, 4  ;;  %v315_v50 = vrot.slane %v298_v41, 4  ;;  %v320_v7 = vsel %vm267_vm1, 0.0, %v319_v52 }
 0x13b   : > { %v317_v43 = vrot.slane %v302_v34, 4  ;;  %v322_v53 = vsel %vm267_vm1, 0.0, %v321_v44  ;;  %v334_v58 = vsel %vm267_vm1, %v321_v44, %v310_v42  ;;  %v316_v5 = vsel %vm267_vm1, 0.0, %v315_v50 }
 0x13c   : > { %v339_v62 = vrot.slane %v322_v53, 4  ;;  %v338_v14 = vperm.slane %v334_v58, %v1579_v16 }
 0x13d   : > { %v318_v51 = vsel %vm267_vm1, 0.0, %v317_v43  ;;  %v323_v8 = vsel %vm267_vm1, %v317_v43, %v298_v41 }
 0x13e   : > { %v328_v61 = vrot.slane %v318_v51, 4  ;;  %v340_v19 = vsel %vm267_vm1, %v339_v62, %v320_v7  ;;  %v327_v22 = vperm.slane %v323_v8, %v1579_v16 }
 0x13f   : > { %v344_v32 = vperm.slane %v340_v19, %v1579_v16 }
 0x140   : > { %v329_v18 = vsel %vm267_vm1, %v328_v61, %v316_v5  ;;  %v347_v35 = vrot.slane %v327_v22, 4 }
 0x141   : > { %v333_v27 = vperm.slane %v329_v18, %v1579_v16 }
 0x143   : > { %v345_v44 = vrot.slane %v333_v27, 4 }
 0x18d   : > { %v1233_v36 = vpop.permute.xlu2 %1232 }
 0x18e   : > { %v1235_v39 = vunpack.i.h.bf16 %v1233_v36  ;;  %v1234_v40 = vunpack.i.l.bf16 %v1233_v36  ;;  %v359_v36 = vrot.slane %v338_v14, 4 }
 0x190   : > { %v405_v46 = vrot.slane %v1235_v39, 4  ;;  %v393_v47 = vrot.slane %v1234_v40, 4 }
 0x19d   : > { %v1228_v45 = vpop.permute.xlu1 %1227 }
 0x19e   : > { %v1230_v48 = vunpack.i.h.bf16 %v1228_v45  ;;  %v1229_v49 = vunpack.i.l.bf16 %v1228_v45 }
 0x1a0   : > { %v407_v54 = vrot.slane %v1230_v48, 4  ;;  %v394_v55 = vsel %vm267_vm1, %v393_v47, %v1229_v49  ;;  %v395_v56 = vrot.slane %v1229_v49, 4  ;;  %v406_v57 = vsel %vm267_vm1, %v405_v46, %v1230_v48 }
 0x1a1   : > { %v400_v59 = vperm.slane %v394_v55, %v1579_v16  ;;  %v412_v60 = vperm.slane %v406_v57, %v1579_v16  ;;  %v357_v48 = vrot.slane %v344_v32, 4  ;;  %v346_v57 = vsel %vm267_vm1, %v345_v44, %v327_v22 }
 0x1a2   : > { %v396_v63 = vsel %vm267_vm1, %v1234_v40, %v395_v56  ;;  %v408_v0 = vsel %vm267_vm1, %v1235_v39, %v407_v54  ;;  %v348_v54 = vsel %vm267_vm1, %v333_v27, %v347_v35  ;;  %v360_v56 = vsel %vm267_vm1, %v344_v32, %v359_v36 }
 0x1a3   : > { %v404_v1 = vperm.slane %v396_v63, %v1579_v16  ;;  %v416_v2 = vperm.slane %v408_v0, %v1579_v16  ;;  %v417_v3 = vrot.slane %v412_v60, 4  ;;  %v419_v4 = vrot.slane %v400_v59, 4 }
 0x1a4   : > { %v358_v61 = vsel %vm267_vm1, %v357_v48, %v338_v14 }
 0x1a5   : > { %v418_v10 = vsel %vm267_vm1, %v417_v3, %v400_v59  ;;  %v420_v11 = vsel %vm267_vm1, %v412_v60, %v419_v4  ;;  %v429_v12 = vrot.slane %v416_v2, 4  ;;  %v431_v13 = vrot.slane %v404_v1, 4 }
 0x1a6   : > { %v424_v15 = vperm.slane %v418_v10, %v1589_v31  ;;  %v428_v17 = vperm.slane %v420_v11, %v1589_v31  ;;  %v368_v3 = vperm.slane %v360_v56, %v1589_v31  ;;  %v352_v4 = vperm.slane %v346_v57, %v1589_v31 }
 0x1a7   : > { %v430_v20 = vsel %vm267_vm1, %v429_v12, %v404_v1  ;;  %v432_v21 = vsel %vm267_vm1, %v416_v2, %v431_v13  ;;  %v356_v1 = vperm.slane %v348_v54, %v1589_v31  ;;  %v364_v12 = vperm.slane %v358_v61, %v1589_v31 }
 0x1a8   : > { %v436_v23 = vperm.slane %v430_v20, %v1589_v31  ;;  %v440_v24 = vperm.slane %v432_v21, %v1589_v31  ;;  %v441_v25 = vrot.slane %v424_v15, 4  ;;  %v443_v26 = vrot.slane %v428_v17, 4 }
 0x1a9   : > { %v375_v17 = vrot.slane %v356_v1, 4  ;;  %v371_v22 = vrot.slane %v352_v4, 4 }
 0x1aa   : > { %v444_v28 = vsel %vm267_vm1, 0.0, %v443_v26  ;;  %v445_v29 = vrot.slane %v436_v23, 4  ;;  %v447_v30 = vrot.slane %v440_v24, 4  ;;  %v449_v33 = vsel %vm267_vm1, %v443_v26, %v424_v15 }
 0x1ab   : > { %v454_v34 = vrot.slane %v444_v28, 4  ;;  %v442_v37 = vsel %vm267_vm1, 0.0, %v441_v25  ;;  %v453_v39 = vperm.slane %v449_v33, %v1579_v16  ;;  %v376_v27 = vsel %vm267_vm1, %v368_v3, %v375_v17 }
 0x1ac   : > { %v448_v38 = vsel %vm267_vm1, 0.0, %v447_v30  ;;  %v460_v40 = vsel %vm267_vm1, %v447_v30, %v436_v23  ;;  %v446_v45 = vsel %vm267_vm1, 0.0, %v445_v29  ;;  %v373_v23 = vrot.slane %v368_v3, 4 }
 0x1ad   : > { %v465_v41 = vrot.slane %v448_v38, 4  ;;  %v455_v42 = vsel %vm267_vm1, %v454_v34, %v442_v37  ;;  %v464_v43 = vperm.slane %v460_v40, %v1579_v16  ;;  %v473_v47 = vrot.slane %v453_v39, 4 }
 0x1ae   : > { %v459_v46 = vperm.slane %v455_v42, %v1579_v16  ;;  %v369_v28 = vrot.slane %v364_v12, 4  ;;  %v372_v30 = vsel %vm267_vm1, %v364_v12, %v371_v22  ;;  %v374_v32 = vsel %vm267_vm1, %v373_v23, %v356_v1 }
 0x1af   : > { %v466_v49 = vsel %vm267_vm1, %v465_v41, %v446_v45  ;;  %v485_v50 = vrot.slane %v464_v43, 4  ;;  %v380_v33 = vpack.c.bf16 %v376_v27, %v376_v27  ;;  %v378_v35 = vpack.c.bf16 %v372_v30, %v372_v30 }
 0x1b0   : > { %v470_v51 = vperm.slane %v466_v49, %v1579_v16  ;;  %v474_v52 = vsel %vm267_vm1, %v459_v46, %v473_v47  ;;  %v471_v53 = vrot.slane %v459_v46, 4  ;;  %v370_v34 = vsel %vm267_vm1, %v369_v28, %v352_v4 }
 0x1b1   : > { %v482_v55 = vperm.slane %v474_v52, %v1589_v31  ;;  %v379_v36 = vpack.c.bf16 %v374_v32, %v374_v32  ;;  %v377_v37 = vpack.c.bf16 %v370_v34, %v370_v34 }
 0x1b2   : > { %v486_v58 = vsel %vm267_vm1, %v470_v51, %v485_v50  ;;  %v472_v59 = vsel %vm267_vm1, %v471_v53, %v453_v39  ;;  %v483_v60 = vrot.slane %v470_v51, 4 }
 0x1b3   : > { %v494_v62 = vperm.slane %v486_v58, %v1589_v31  ;;  %v501_v63 = vrot.slane %v482_v55, 4  ;;  %v478_v0 = vperm.slane %v472_v59, %v1589_v31 }
 0x1b4   : > { %v484_v2 = vsel %vm267_vm1, %v483_v60, %v464_v43 }
 0x1b5   : > { %v502_v5 = vsel %vm267_vm1, %v494_v62, %v501_v63  ;;  %v490_v7 = vperm.slane %v484_v2, %v1589_v31  ;;  %v497_v8 = vrot.slane %v478_v0, 4  ;;  %v499_v10 = vrot.slane %v494_v62, 4 }
 0x1b6   : > { %v506_v11 = vpack.c.bf16 %v502_v5, %v502_v5 }
 0x1b7   : > { %v498_v13 = vsel %vm267_vm1, %v490_v7, %v497_v8  ;;  %v500_v14 = vsel %vm267_vm1, %v499_v10, %v482_v55  ;;  %v495_v15 = vrot.slane %v490_v7, 4 }
 0x1b8   : > { %v695_v18 = vsel %vm633_vm2, %v506_v11, 0  ;;  %v504_v19 = vpack.c.bf16 %v498_v13, %v498_v13  ;;  %v505_v20 = vpack.c.bf16 %v500_v14, %v500_v14 }
 0x1b9   : > { %704 = vmatpush.bf16.xpose.msrb.mxu0 %v695_v18  ;;  %v496_v21 = vsel %vm267_vm1, %v495_v15, %v478_v0 }
 0x1ba   : > { %v657_v24 = vsel %vm633_vm2, %v504_v19, 0  ;;  %v676_v25 = vsel %vm633_vm2, %v505_v20, 0  ;;  %v503_v26 = vpack.c.bf16 %v496_v21, %v496_v21 }
 0x1bb   : > { %666 = vmatpush.bf16.xpose.msra.mxu2 %v657_v24  ;;  %685 = vmatpush.bf16.xpose.msra.mxu3 %v676_v25 }
 0x1bc   : > { %v638_v29 = vsel %vm633_vm2, %v503_v26, 0 }
 0x1bd   : > { %647 = vmatpush.bf16.xpose.msra.mxu1 %v638_v29 }
 0x1c0   : > { %1125 = vmatmul.msk.bf16.vlgmr.msrb.gmra.mxu0 %vm633_vm2, %v380_v33 }
 0x1c2   : > { %1123 = vmatmul.msk.bf16.vlgmr.msra.gmra.mxu2 %vm633_vm2, %v378_v35  ;;  %1124 = vmatmul.msk.bf16.vlgmr.msra.gmra.mxu3 %vm633_vm2, %v379_v36 }
 0x1c4   : > { %1122 = vmatmul.msk.bf16.vlgmr.msra.gmra.mxu1 %vm633_vm2, %v377_v37 }
 0x23d   : > { %v706_v38 = vpop.f32.mrf.mxu0 }
 0x23e   : > { %v719_v39 = vsel %vm633_vm2, %v706_v38, -inf }
 0x23f   : > { %720 = vmax.xlane.f32.xlu2 %v719_v39 }
 0x241   : > { %v649_v40 = vpop.f32.mrf.mxu1 }
 0x242   : > { %v710_v41 = vsel %vm633_vm2, %v649_v40, -inf }
 0x243   : > { %711 = vmax.xlane.f32.xlu1 %v710_v41 }
 0x245   : > { %v668_v42 = vpop.f32.mrf.mxu2  ;;  %v687_v43 = vpop.f32.mrf.mxu3 }
 0x246   : > { %v708_v44 = vpop.f32.mrf.mxu0  ;;  %v713_v45 = vsel %vm633_vm2, %v668_v42, -inf  ;;  %v716_v46 = vsel %vm633_vm2, %v687_v43, -inf }
 0x247   : > { %714 = vmax.xlane.f32.xlu0 %v713_v45  ;;  %717 = vmax.xlane.f32.xlu2 %v716_v46 }
 0x249   : > { %v651_v47 = vpop.f32.mrf.mxu1 }
 0x24d   : > { %v670_v48 = vpop.f32.mrf.mxu2  ;;  %v689_v49 = vpop.f32.mrf.mxu3 }
 0x25b   : > { %1242 = vrot.lane.b32.xlu0 %v1574_v9, %s1434_s26 }
 0x25f   : > { %1237 = vrot.lane.b32.xlu2 %v1571_v6, %s1434_s26 }
 0x2b2   : > { %v721_v50 = vpop.xlane.xlu2 %720 }
 0x2b3   : > { %v725_v51 = vsub.f32 %v706_v38, %v721_v50 }
 0x2b5   : > { %v732_v52 = vmul.f32 1.442695, %v725_v51 }
 0x2b6   : > { %v712_v60 = vpop.xlane.xlu1 %711 }
 0x2b7   : > { %1246 = vpow2.f32 %v732_v52  ;;  %v722_v61 = vsub.f32 %v649_v40, %v712_v60 }
 0x2b9   : > { %v726_v0 = vmul.f32 1.442695, %v722_v61 }
 0x2ba   : > { %v718_v53 = vpop.xlane.xlu2 %717  ;;  %v715_v54 = vpop.xlane.xlu0 %714 }
 0x2bb   : > { %v724_v55 = vsub.f32 %v687_v43, %v718_v53  ;;  %v723_v58 = vsub.f32 %v668_v42, %v715_v54 }
 0x2bd   : > { %v1675_v56 = vpop.eup %1246  ;;  %v730_v57 = vmul.f32 1.442695, %v724_v55  ;;  %v728_v9 = vmul.f32 1.442695, %v723_v58 }
 0x2be   : > { %v743_v59 = vsel %vm633_vm2, %v1675_v56, 0.0 }
 0x2bf   : > { %744 = vadd.xlane.f32.xlu0 %v743_v59  ;;  %1248 = vpow2.f32 %v730_v57 }
 0x2c0   : > { %1250 = vpow2.f32 %v728_v9 }
 0x2c1   : > { %1252 = vpow2.f32 %v726_v0 }
 0x2c2   : > { %v1238_v62 = vpop.permute.xlu2 %1237 }
 0x2c3   : > { %v1240_v1 = vunpack.i.h.bf16 %v1238_v62  ;;  %v1239_v2 = vunpack.i.l.bf16 %v1238_v62 }
 0x2c5   : > { %v1679_v6 = vpop.eup %1248  ;;  %v533_v5 = vrot.slane %v1240_v1, 4  ;;  %v521_v7 = vrot.slane %v1239_v2, 4 }
 0x2c6   : > { %v740_v63 = vsel %vm633_vm2, %v1679_v6, 0.0  ;;  %v1683_v3 = vpop.eup %1250 }
 0x2c7   : > { %741 = vadd.xlane.f32.xlu1 %v740_v63  ;;  %v737_v11 = vsel %vm633_vm2, %v1683_v3, 0.0  ;;  %v1693_v21 = vpop.eup %1252 }
 0x2c8   : > { %v734_v35 = vsel %vm633_vm2, %v1693_v21, 0.0 }
 0x2cd   : > { %v1243_v4 = vpop.permute.xlu0 %1242 }
 0x2ce   : > { %v1245_v8 = vunpack.i.h.bf16 %v1243_v4  ;;  %v1244_v10 = vunpack.i.l.bf16 %v1243_v4 }
 0x2cf   : > { %738 = vadd.xlane.f32.xlu1 %v737_v11 }
 0x2d0   : > { %v531_v12 = vrot.slane %v1245_v8, 4  ;;  %v519_v13 = vrot.slane %v1244_v10, 4  ;;  %v522_v14 = vsel %vm267_vm1, %v1244_v10, %v521_v7  ;;  %v534_v15 = vsel %vm267_vm1, %v1245_v8, %v533_v5 }
 0x2d1   : > { %v530_v17 = vperm.slane %v522_v14, %v1579_v16  ;;  %v542_v18 = vperm.slane %v534_v15, %v1579_v16 }
 0x2d2   : > { %v520_v19 = vsel %vm267_vm1, %v519_v13, %v1239_v2  ;;  %v532_v20 = vsel %vm267_vm1, %v531_v12, %v1240_v1 }
 0x2d3   : > { %v526_v22 = vperm.slane %v520_v19, %v1579_v16  ;;  %v538_v23 = vperm.slane %v532_v20, %v1579_v16  ;;  %v555_v24 = vrot.slane %v542_v18, 4  ;;  %v557_v25 = vrot.slane %v530_v17, 4 }
 0x2d5   : > { %v543_v26 = vrot.slane %v538_v23, 4  ;;  %v545_v27 = vrot.slane %v526_v22, 4  ;;  %v556_v28 = vsel %vm267_vm1, %v555_v24, %v530_v17  ;;  %v558_v29 = vsel %vm267_vm1, %v542_v18, %v557_v25 }
 0x2d6   : > { %v562_v30 = vperm.slane %v556_v28, %v1589_v31  ;;  %v566_v32 = vperm.slane %v558_v29, %v1589_v31 }
 0x2d7   : > { %v544_v33 = vsel %vm267_vm1, %v543_v26, %v526_v22  ;;  %v546_v34 = vsel %vm267_vm1, %v538_v23, %v545_v27  ;;  %735 = vadd.xlane.f32.xlu1 %v734_v35 }
 0x2d8   : > { %v550_v36 = vperm.slane %v544_v33, %v1589_v31  ;;  %v554_v37 = vperm.slane %v546_v34, %v1589_v31  ;;  %v571_v38 = vrot.slane %v562_v30, 4  ;;  %v573_v39 = vrot.slane %v566_v32, 4 }
 0x2da   : > { %v567_v40 = vrot.slane %v550_v36, 4  ;;  %v569_v41 = vrot.slane %v554_v37, 4  ;;  %v574_v42 = vsel %vm267_vm1, 0.0, %v573_v39  ;;  %v586_v43 = vsel %vm267_vm1, %v573_v39, %v562_v30 }
 0x2db   : > { %v591_v44 = vrot.slane %v574_v42, 4  ;;  %v572_v46 = vsel %vm267_vm1, 0.0, %v571_v38  ;;  %v590_v48 = vperm.slane %v586_v43, %v1579_v16 }
 0x2dc   : > { %v570_v45 = vsel %vm267_vm1, 0.0, %v569_v41  ;;  %v575_v47 = vsel %vm267_vm1, %v569_v41, %v550_v36  ;;  %v568_v52 = vsel %vm267_vm1, 0.0, %v567_v40 }
 0x2dd   : > { %v580_v49 = vrot.slane %v570_v45, 4  ;;  %v579_v50 = vperm.slane %v575_v47, %v1579_v16  ;;  %v592_v51 = vsel %vm267_vm1, %v591_v44, %v572_v46  ;;  %v611_v54 = vrot.slane %v590_v48, 4 }
 0x2de   : > { %v596_v53 = vperm.slane %v592_v51, %v1579_v16 }
 0x2df   : > { %v581_v55 = vsel %vm267_vm1, %v580_v49, %v568_v52  ;;  %v599_v57 = vrot.slane %v579_v50, 4 }
 0x2e0   : > { %v585_v58 = vperm.slane %v581_v55, %v1579_v16  ;;  %v612_v59 = vsel %vm267_vm1, %v596_v53, %v611_v54  ;;  %v609_v60 = vrot.slane %v596_v53, 4 }
 0x2e1   : > { %v620_v9 = vperm.slane %v612_v59, %v1589_v31 }
 0x2e2   : > { %v600_v61 = vsel %vm267_vm1, %v585_v58, %v599_v57  ;;  %v597_v62 = vrot.slane %v585_v58, 4  ;;  %v610_v63 = vsel %vm267_vm1, %v609_v60, %v590_v48 }
 0x2e3   : > { %v608_v0 = vperm.slane %v600_v61, %v1589_v31  ;;  %v625_v1 = vrot.slane %v620_v9, 4  ;;  %v616_v2 = vperm.slane %v610_v63, %v1589_v31 }
 0x2e4   : > { %v598_v4 = vsel %vm267_vm1, %v597_v62, %v579_v50 }
 0x2e5   : > { %v626_v5 = vsel %vm267_vm1, %v625_v1, %v608_v0  ;;  %v627_v7 = vrot.slane %v608_v0, 4  ;;  %v604_v8 = vperm.slane %v598_v4, %v1589_v31  ;;  %v621_v10 = vrot.slane %v616_v2, 4 }
 0x2e6   : > { %v631_v11 = vpack.c.bf16 %v626_v5, %v626_v5 }
 0x2e7   : > { %v622_v12 = vsel %vm267_vm1, %v621_v10, %v604_v8  ;;  %v628_v13 = vsel %vm267_vm1, %v620_v9, %v627_v7  ;;  %v623_v14 = vrot.slane %v604_v8, 4 }
 0x2e8   : > { %v801_v15 = vsel %vm761_vm3, %v631_v11, 0  ;;  %v629_v17 = vpack.c.bf16 %v622_v12, %v622_v12  ;;  %v632_v18 = vpack.c.bf16 %v628_v13, %v628_v13 }
 0x2e9   : > { %810 = vmatpush.bf16.msrb.mxu3 %v801_v15  ;;  %v624_v19 = vsel %vm267_vm1, %v616_v2, %v623_v14 }
 0x2ea   : > { %v763_v20 = vsel %vm761_vm3, %v629_v17, 0  ;;  %v820_v22 = vsel %vm761_vm3, %v632_v18, 0  ;;  %v630_v23 = vpack.c.bf16 %v624_v19, %v624_v19 }
 0x2eb   : > { %772 = vmatpush.bf16.msrb.mxu1 %v763_v20  ;;  %829 = vmatpush.bf16.msra.mxu0 %v820_v22 }
 0x2ec   : > { %v782_v24 = vsel %vm761_vm3, %v630_v23, 0 }
 0x2ed   : > { %791 = vmatpush.bf16.msrb.mxu2 %v782_v24 }
 0x332   : > { %v745_v25 = vpop.xlane.xlu0 %744 }
 0x333   : > { %1254 = vrcp.f32 %v745_v25 }
 0x339   : > { %v1255_v26 = vpop.eup %1254 }
 0x33a   : > { %v753_v27 = vmul.f32 %v1255_v26, %v1675_v56  ;;  %v742_v28 = vpop.xlane.xlu1 %741 }
 0x33b   : > { %1256 = vrcp.f32 %v742_v28 }
 0x33c   : > { %v757_v29 = vpack.c.bf16 %v753_v27, %v753_v27 }
 0x33e   : > { %1129 = vmatmul.msk.bf16.vlgmr.msra.gmra.mxu0 %vm633_vm2, %v757_v29 }
 0x341   : > { %v1257_v30 = vpop.eup %1256 }
 0x342   : > { %v752_v32 = vmul.f32 %v1257_v30, %v1679_v6  ;;  %v739_v33 = vpop.xlane.xlu1 %738 }
 0x343   : > { %1258 = vrcp.f32 %v739_v33 }
 0x344   : > { %v756_v34 = vpack.c.bf16 %v752_v32, %v752_v32 }
 0x346   : > { %1128 = vmatmul.msk.bf16.vlgmr.msrb.gmra.mxu3 %vm633_vm2, %v756_v34 }
 0x349   : > { %v1259_v35 = vpop.eup %1258 }
 0x34a   : > { %v751_v36 = vmul.f32 %v1259_v35, %v1683_v3  ;;  %v736_v37 = vpop.xlane.xlu1 %735 }
 0x34b   : > { %1260 = vrcp.f32 %v736_v37 }
 0x34c   : > { %v755_v38 = vpack.c.bf16 %v751_v36, %v751_v36 }
 0x34e   : > { %1127 = vmatmul.msk.bf16.vlgmr.msrb.gmra.mxu2 %vm633_vm2, %v755_v38 }
 0x351   : > { %v1261_v56 = vpop.eup %1260 }
 0x352   : > { %v750_v39 = vmul.f32 %v1261_v56, %v1693_v21 }
 0x354   : > { %v754_v40 = vpack.c.bf16 %v750_v39, %v750_v39 }
 0x356   : > { %1126 = vmatmul.msk.bf16.vlgmr.msrb.gmra.mxu1 %vm633_vm2, %v754_v40 }
 0x3bb   : > { %v831_v6 = vpop.f32.mrf.mxu0 }
 0x3bc   : > { %v847_v43 = vrot.slane %v831_v6, 4 }
 0x3c3   : > { %v833_v41 = vpop.f32.mrf.mxu0 }
 0x3c9   : > { %v812_v42 = vpop.f32.mrf.mxu3 }
 0x3ca   : > { %v835_v46 = vrot.slane %v812_v42, 4 }
 0x3d1   : > { %v793_v44 = vpop.f32.mrf.mxu2  ;;  %v814_v45 = vpop.f32.mrf.mxu3 }
 0x3d2   : > { %v848_v3 = vsel %vm267_vm1, %v847_v43, %v793_v44  ;;  %v849_v47 = vrot.slane %v793_v44, 4 }
 0x3d3   : > { %v854_v48 = vperm.slane %v848_v3, %v1579_v16  ;;  %v774_v49 = vpop.f32.mrf.mxu1  ;;  %v1145_v3 = vld [vmem:[#allocation7] sm:$0xff] }
 0x3d4   : > { %v850_v50 = vsel %vm267_vm1, %v831_v6, %v849_v47  ;;  %v836_v21 = vsel %vm267_vm1, %v835_v46, %v774_v49  ;;  %v837_v51 = vrot.slane %v774_v49, 4 }
 0x3d5   : > { %v858_v52 = vperm.slane %v850_v50, %v1579_v16  ;;  %v859_v53 = vrot.slane %v854_v48, 4  ;;  %v842_v54 = vperm.slane %v836_v21, %v1579_v16 }
 0x3d6   : > { %v838_v55 = vsel %vm267_vm1, %v812_v42, %v837_v51 }
 0x3d7   : > { %v871_v57 = vrot.slane %v858_v52, 4  ;;  %v846_v58 = vperm.slane %v838_v55, %v1579_v16  ;;  %v860_v59 = vsel %vm267_vm1, %v859_v53, %v842_v54  ;;  %v861_v60 = vrot.slane %v842_v54, 4 }
 0x3d8   : > { %v866_v9 = vperm.slane %v860_v59, %v1589_v31 }
 0x3d9   : > { %v862_v61 = vsel %vm267_vm1, %v854_v48, %v861_v60  ;;  %v872_v62 = vsel %vm267_vm1, %v871_v57, %v846_v58  ;;  %v873_v63 = vrot.slane %v846_v58, 4  ;;  %v795_v0 = vpop.f32.mrf.mxu2 }
 0x3da   : > { %v870_v1 = vperm.slane %v862_v61, %v1589_v31  ;;  %v878_v2 = vperm.slane %v872_v62, %v1589_v31  ;;  %v883_v8 = vrot.slane %v866_v9, 4 }
 0x3db   : > { %v874_v4 = vsel %vm267_vm1, %v858_v52, %v873_v63  ;;  %v776_v5 = vpop.f32.mrf.mxu1 }
 0x3dc   : > { %v882_v7 = vperm.slane %v874_v4, %v1589_v31  ;;  %v885_v10 = vrot.slane %v870_v1, 4  ;;  %v887_v12 = vrot.slane %v878_v2, 4  ;;  %v884_v18 = vsel %vm267_vm1, 0.0, %v883_v8 }
 0x3de   : > { %v886_v11 = vsel %vm267_vm1, 0.0, %v885_v10  ;;  %v889_v13 = vrot.slane %v882_v7, 4  ;;  %v891_v14 = vsel %vm267_vm1, %v885_v10, %v866_v9  ;;  %v888_v25 = vsel %vm267_vm1, 0.0, %v887_v12 }
 0x3df   : > { %v896_v15 = vrot.slane %v886_v11, 4  ;;  %v895_v17 = vperm.slane %v891_v14, %v1579_v16 }
 0x3e0   : > { %v890_v19 = vsel %vm267_vm1, 0.0, %v889_v13  ;;  %v902_v20 = vsel %vm267_vm1, %v889_v13, %v878_v2 }
 0x3e1   : > { %v907_v22 = vrot.slane %v890_v19, 4  ;;  %v897_v23 = vsel %vm267_vm1, %v896_v15, %v884_v18  ;;  %v906_v24 = vperm.slane %v902_v20, %v1579_v16  ;;  %v915_v27 = vrot.slane %v895_v17, 4 }
 0x3e2   : > { %v901_v26 = vperm.slane %v897_v23, %v1579_v16 }
 0x3e3   : > { %v908_v28 = vsel %vm267_vm1, %v907_v22, %v888_v25  ;;  %v927_v29 = vrot.slane %v906_v24, 4 }
 0x3e4   : > { %v912_v30 = vperm.slane %v908_v28, %v1579_v16  ;;  %v913_v32 = vrot.slane %v901_v26, 4  ;;  %v916_v33 = vsel %vm267_vm1, %v901_v26, %v915_v27 }
 0x3e5   : > { %v924_v39 = vperm.slane %v916_v33, %v1589_v31 }
 0x3e6   : > { %v928_v34 = vsel %vm267_vm1, %v912_v30, %v927_v29  ;;  %v914_v35 = vsel %vm267_vm1, %v913_v32, %v895_v17  ;;  %v925_v36 = vrot.slane %v912_v30, 4 }
 0x3e7   : > { %v936_v37 = vperm.slane %v928_v34, %v1589_v31  ;;  %v920_v38 = vperm.slane %v914_v35, %v1589_v31  ;;  %v943_v45 = vrot.slane %v924_v39, 4 }
 0x3e8   : > { %v926_v56 = vsel %vm267_vm1, %v925_v36, %v906_v24 }
 0x3e9   : > { %v941_v40 = vrot.slane %v936_v37, 4  ;;  %v932_v6 = vperm.slane %v926_v56, %v1589_v31  ;;  %v939_v16 = vrot.slane %v920_v38, 4  ;;  %v944_v46 = vsel %vm267_vm1, %v936_v37, %v943_v45  ;;  %v1146_v31 = vld [vmem:[#allocation7 + $0x8] sm:$0xff] }
 0x3ea   : > { %988 = vmatpush.bf16.msra.mxu1 %v1146_v31 }
 0x3eb   : > { %v942_v41 = vsel %vm267_vm1, %v941_v40, %v924_v39  ;;  %v937_v42 = vrot.slane %v932_v6, 4  ;;  %v940_v43 = vsel %vm267_vm1, %v932_v6, %v939_v16 }
 0x3ec   : > { %950 = vrot.lane.b32.xlu1 %v942_v41, %s1435_s27  ;;  %946 = vrot.lane.b32.xlu2 %v940_v43, %s1436_s28 }
 0x3ed   : > { %v938_v44 = vsel %vm267_vm1, %v937_v42, %v920_v38 }
 0x3ee   : > { %989 = vmatpush.bf16.msra.mxu1 %v1145_v3 }
 0x3f4   : > { %954 = vrot.lane.b32.xlu2 %v944_v46, %s1437_s29 }
 0x446   : > { %v947_v47 = vpop.permute.xlu2 %946 }
 0x447   : > { %v957_v48 = vsel %vm633_vm2, %v938_v44, %v947_v47 }
 0x44e   : > { %v955_v50 = vpop.permute.xlu2 %954 }
 0x45e   : > { %v951_v49 = vpop.permute.xlu1 %950 }
 0x45f   : > { %v959_v21 = vsel %vm958_vm4, %v957_v48, %v951_v49 }
 0x460   : > { %v961_v51 = vsel %vm960_vm5, %v959_v21, %v955_v50 }
 0x461   : > { %v962_v52 = vpack.c.bf16 %v961_v51, %v961_v51 }
 0x463   : > { %1138 = vmatmul.msk.bf16.vlgmr.msra.gmra.mxu1 %vm239_vm0, %v962_v52 }
 0x4e0   : > { %v991_v53 = vpop.f32.mrf.mxu1 }
 0x4e1   : > { %995 = vst.msk [vmem:[%s220_s8] sm:$0xff] %vm239_vm0, %v991_v53 }
 0x4e2   : > { %1379 = shalt.err (!%p1376_p9)
}
 0x4e3   : > { %1157 = dma.vmem_to_hbm [thread:$0]  (%p1527_p4), %s1010_s21, 128, %s1012_s22, %s997_s23  }
 0x4e8   : > { %v993_v54 = vpop.f32.mrf.mxu1 }
 0x4e9 PF: > { %s1023_s10 = sand.u32 1, %s1410_s12   ;;  %p1830_p10 = scmp.ge.s32.totalorder %s1422_s15, 2 }
 0x4ea   : > { %s1024_s28 = scalar_lea.sflag [#allocation4], %s1023_s10 }
 0x4eb   : > { %p1171_p13 = pnand %p1830_p10, %p1531_p6 }
 0x4ed   : > { %p1172_p11 = pneg %p1171_p13 }
 0x4ef   : > { %1405 = dma.done.wait (%p1172_p11), %s1024_s28, 128  }
 0x4f0   : > { %1407 = vsyncadd (%p1172_p11), %s1024_s28, 4294967168  ;;  %p17_p0 = scmp.ge.s32.totalorder %s1501_s4, 4   ;;  %s1831_s12 = smov %s1414_s13 }
 0x4f1   : > { %s1832_s13 = smov %s1418_s14  ;;  %s1833_s14 = smov %s1512_s7 }
 0x4f2   : > { %s1834_s15 = smov %s1501_s4  ;;  %19 = sbr.rel (!%p17_p0) target bundleno = 6 (0x6), region = 85 }
 0x4f7   :  { %1030 = vsyncpa [#allocation3], 1 }
 0x4f8   :  { %1032 = vsyncpa [#allocation3 + $0x1], 1 }
 0x4f9   :  { %1033 = vsyncpa [#allocation6], 1 }
 0x4fa   :  { %1034 = vsyncpa [#allocation4], 1 }
 0x4fb   :  { %1036 = vsyncpa [#allocation4 + $0x1], 1 }

</bundles_post_ra>
